<compile_context>
chip_gen: v6e
topology: v6e:2x2x1
jax: 0.10.0
libtpu: 0.0.40
codegen_flags: <defaults>
</compile_context>

<pallas_src>
import jax
import jax.numpy as jnp
from jax import lax
from jax.experimental import pallas as pl
from jax.experimental.pallas import tpu as pltpu

BN_EPS = 1e-5
LANE = 128


def _mlp_kernel_t(x_ref, w1_ref, b1_ref, w2_ref, b2_ref, w3_ref, b3_ref, o_ref):
    # Feature-major layout: batch on the lane axis. BatchNorm is pre-folded into
    # (w, b); Dropout(0.2) is identity in eval mode.
    xt = x_ref[...]                                                   # (in_dim, tile_b)

    h = jnp.dot(w1_ref[...], xt, preferred_element_type=jnp.float32) + b1_ref[...]
    h = jnp.maximum(h, 0.0)                                           # (h1, tile_b) f32

    h = jnp.dot(w2_ref[...], h.astype(w2_ref.dtype),
                preferred_element_type=jnp.float32) + b2_ref[...]
    h = jnp.maximum(h, 0.0)                                           # (h2, tile_b) f32

    out = jnp.dot(w3_ref[...], h.astype(w3_ref.dtype),
                  preferred_element_type=jnp.float32) + b3_ref[...]   # (out_dim, tile_b)
    o_ref[...] = out.astype(o_ref.dtype)


def _round_up(x, m):
    return ((x + m - 1) // m) * m


def _fold_batchnorm(params):
    """Fold eval-mode BatchNorm1d into the preceding Linear layers."""
    s1 = params["g1"] * lax.rsqrt(params["v1"] + BN_EPS)
    w1 = params["w1"] * s1
    b1 = (params["b1"] - params["m1"]) * s1 + params["be1"]
    s2 = params["g2"] * lax.rsqrt(params["v2"] + BN_EPS)
    w2 = params["w2"] * s2
    b2 = (params["b2"] - params["m2"]) * s2 + params["be2"]
    return w1, b1, w2, b2, params["w3"], params["b3"]


def _choose_tile_b(B, cap=8192):
    """tile_b is the lane-axis (batch) tile: multiple of 128, as large as practical."""
    b_pad = _round_up(max(B, 1), LANE)
    if b_pad <= cap:
        # One tile: no forced split -- per-step overhead (~0.35us) would dominate
        # the tiny per-tile data movement once output padding is gone.
        return b_pad
    steps = -(-B // cap)
    if steps % 2 == 1:
        steps += 1  # even step count so v7x's two TensorCores load-balance
    return max(LANE, _round_up(-(-B // steps), LANE))


def imputation_model_forward(x, params, *, tile_b=None, compute_dtype=jnp.bfloat16):
    """Fused MLP forward (PyTorch eval-mode semantics).

    x: (B, input_dim) float32.
    params: dict with keys w1,b1,g1,be1,m1,v1,w2,b2,g2,be2,m2,v2,w3,b3.
            Weights wi are (in_dim, out_dim); all per-feature vectors are (1, dim).
    """
    B, in_dim = x.shape
    out_dim = params["w3"].shape[1]

    w1, b1, w2, b2, w3, b3 = _fold_batchnorm(params)
    h1 = w1.shape[1]
    h2 = w2.shape[1]

    # Feature-major parameter prep: weights (out, in) in compute_dtype, biases (out, 1) f32.
    w1t = w1.T.astype(compute_dtype)
    w2t = w2.T.astype(compute_dtype)
    w3t = w3.T.astype(compute_dtype)
    b1t = b1.reshape(-1, 1).astype(jnp.float32)
    b2t = b2.reshape(-1, 1).astype(jnp.float32)
    b3t = b3.reshape(-1, 1).astype(jnp.float32)

    if tile_b is None:
        tile_b = _choose_tile_b(B)
    else:
        tile_b = max(LANE, _round_up(tile_b, LANE))

    B_pad = _round_up(B, tile_b)
    x_t = x.T.astype(compute_dtype)                    # (in_dim, B)
    if B_pad != B:
        x_t = jnp.pad(x_t, ((0, 0), (0, B_pad - B)))

    param_arrays = [w1t, b1t, w2t, b2t, w3t, b3t]

    def full_spec(a):
        nd = a.ndim
        return pl.BlockSpec(a.shape, lambda i, _nd=nd: (0,) * _nd)

    in_specs = [pl.BlockSpec((in_dim, tile_b), lambda i: (0, i))]
    in_specs += [full_spec(a) for a in param_arrays]
    out_spec = pl.BlockSpec((out_dim, tile_b), lambda i: (0, i))

    flops = 2 * B_pad * (in_dim * h1 + h1 * h2 + h2 * out_dim)
    bytes_accessed = int(x_t.size) * jnp.dtype(x_t.dtype).itemsize
    bytes_accessed += B_pad * out_dim * 4
    bytes_accessed += sum(int(a.size) * jnp.dtype(a.dtype).itemsize for a in param_arrays)

    out_t = pl.pallas_call(
        _mlp_kernel_t,
        out_shape=jax.ShapeDtypeStruct((out_dim, B_pad), jnp.float32),
        grid_spec=pltpu.PrefetchScalarGridSpec(
            num_scalar_prefetch=0,
            grid=(B_pad // tile_b,),
            in_specs=in_specs,
            out_specs=out_spec,
        ),
        compiler_params=pltpu.CompilerParams(
            dimension_semantics=("parallel",),
        ),
        cost_estimate=pl.CostEstimate(
            flops=flops, transcendentals=0, bytes_accessed=int(bytes_accessed)),
    )(x_t, *param_arrays)

    # (out_dim, B_pad) -> (B, out_dim); wrapper transpose costs ~out_dim*4 B/row.
    return out_t[:, :B].T


def init_params(key, input_dim, output_dim, hidden_dims=(64, 32)):
    """Deterministic synthetic parameters matching the PyTorch module's shapes."""
    h1, h2 = hidden_dims
    keys = jax.random.split(key, 8)

    def linear(kw, kb, fan_in, fan_out):
        # small deterministic init; stored transposed as (in, out)
        w = jax.random.normal(kw, (fan_in, fan_out), jnp.float32) * (1.0 / jnp.sqrt(fan_in))
        b = jax.random.normal(kb, (1, fan_out), jnp.float32) * 0.01
        return w, b

    w1, b1 = linear(keys[0], keys[1], input_dim, h1)
    w2, b2 = linear(keys[2], keys[3], h1, h2)
    w3, b3 = linear(keys[4], keys[5], h2, output_dim)

    # BatchNorm1d parameters (affine) + running statistics (eval-mode forward)
    g1 = jnp.ones((1, h1), jnp.float32)
    be1 = jnp.zeros((1, h1), jnp.float32)
    m1 = jax.random.normal(keys[6], (1, h1), jnp.float32) * 0.1
    v1 = jnp.ones((1, h1), jnp.float32) * 0.9

    g2 = jnp.ones((1, h2), jnp.float32)
    be2 = jnp.zeros((1, h2), jnp.float32)
    m2 = jax.random.normal(keys[7], (1, h2), jnp.float32) * 0.1
    v2 = jnp.ones((1, h2), jnp.float32) * 1.1

    return dict(w1=w1, b1=b1, g1=g1, be1=be1, m1=m1, v1=v1,
                w2=w2, b2=b2, g2=g2, be2=be2, m2=m2, v2=v2,
                w3=w3, b3=b3)


def reference_forward(x, p):
    """Pure-JAX f32 reference (un-folded BN) for correctness checking."""
    h = x @ p["w1"] + p["b1"]
    h = (h - p["m1"]) / jnp.sqrt(p["v1"] + BN_EPS) * p["g1"] + p["be1"]
    h = jnp.maximum(h, 0.0)
    h = h @ p["w2"] + p["b2"]
    h = (h - p["m2"]) / jnp.sqrt(p["v2"] + BN_EPS) * p["g2"] + p["be2"]
    h = jnp.maximum(h, 0.0)
    return h @ p["w3"] + p["b3"]


if __name__ == "__main__":
    input_dim, output_dim = 16, 8
    hidden_dims = (64, 32)
    batch = 16

    key = jax.random.PRNGKey(0)
    kx, kp = jax.random.split(key)

    x = jax.random.normal(kx, (batch, input_dim), jnp.float32)
    params = init_params(kp, input_dim, output_dim, hidden_dims)

    ref = reference_forward(x, params)
    scale = float(jnp.max(jnp.abs(ref)))

    # Default path: bf16 matmul operands, f32 accumulation, feature-major lane-dense output.
    out = jax.block_until_ready(imputation_model_forward(x, params))
    assert out.shape == (batch, output_dim), out.shape
    err = float(jnp.max(jnp.abs(out - ref)))
    assert err <= 5e-2 * scale + 1e-3, f"bf16 path max abs err {err} (scale {scale})"

    # f32 path (tighter check of the folded-BN math + layout plumbing).
    out32 = jax.block_until_ready(
        imputation_model_forward(x, params, tile_b=128, compute_dtype=jnp.float32))
    err32 = float(jnp.max(jnp.abs(out32 - ref)))
    assert err32 <= 2e-2 * scale + 1e-4, f"f32 path max abs err {err32} (scale {scale})"

    print("KERNEL_OK")
</pallas_src>

<mosaic_0001>
module attributes {stable_mosaic.version = 11 : i64} {
  func.func @_mlp_kernel_t(%arg0: i32, %arg1: memref<16x128xbf16, #tpu.memory_space<vmem>>, %arg2: memref<64x16xbf16, #tpu.memory_space<vmem>>, %arg3: memref<64x1xf32, #tpu.memory_space<vmem>>, %arg4: memref<32x64xbf16, #tpu.memory_space<vmem>>, %arg5: memref<32x1xf32, #tpu.memory_space<vmem>>, %arg6: memref<8x32xbf16, #tpu.memory_space<vmem>>, %arg7: memref<8x1xf32, #tpu.memory_space<vmem>>, %arg8: memref<8x128xf32, #tpu.memory_space<vmem>>) attributes {dimension_semantics = [#tpu.dimension_semantics<parallel>], iteration_bounds = array<i64: 1>, scalar_prefetch = 0 : i64, scratch_operands = 0 : i64, tpu.core_type = #tpu.core_type<tc>, window_params = [{transform_indices = @transform_0, window_bounds = array<i64: 16, 128>}, {pipeline_mode = #tpu.pipeline_mode<synchronous>, transform_indices = @transform_1, window_bounds = array<i64: 64, 16>}, {pipeline_mode = #tpu.pipeline_mode<synchronous>, transform_indices = @transform_2, window_bounds = array<i64: 64, 1>}, {pipeline_mode = #tpu.pipeline_mode<synchronous>, transform_indices = @transform_3, window_bounds = array<i64: 32, 64>}, {pipeline_mode = #tpu.pipeline_mode<synchronous>, transform_indices = @transform_4, window_bounds = array<i64: 32, 1>}, {pipeline_mode = #tpu.pipeline_mode<synchronous>, transform_indices = @transform_5, window_bounds = array<i64: 8, 32>}, {pipeline_mode = #tpu.pipeline_mode<synchronous>, transform_indices = @transform_6, window_bounds = array<i64: 8, 1>}, {transform_indices = @transform_7, window_bounds = array<i64: 8, 128>}]} {
    %c0 = arith.constant 0 : index
    %c0_0 = arith.constant 0 : index
    %0 = vector.load %arg1[%c0, %c0_0] : memref<16x128xbf16, #tpu.memory_space<vmem>>, vector<16x128xbf16>
    %c0_1 = arith.constant 0 : index
    %c0_2 = arith.constant 0 : index
    %1 = vector.load %arg2[%c0_1, %c0_2] : memref<64x16xbf16, #tpu.memory_space<vmem>>, vector<64x16xbf16>
    %cst = arith.constant dense<0.000000e+00> : vector<64x128xf32>
    %2 = tpu.matmul %1, %0, %cst {dimension_numbers = #tpu.dot_dimension_numbers<[1], [0], [0], [1], [0, 0, 1, 1], [], []>} : vector<64x16xbf16>, vector<16x128xbf16>, vector<64x128xf32> -> vector<64x128xf32>
    %c0_3 = arith.constant 0 : index
    %c0_4 = arith.constant 0 : index
    %3 = vector.load %arg3[%c0_3, %c0_4] : memref<64x1xf32, #tpu.memory_space<vmem>>, vector<64x1xf32>
    %4 = vector.broadcast %3 : vector<64x1xf32> to vector<64x128xf32>
    %5 = arith.addf %2, %4 : vector<64x128xf32>
    %cst_5 = arith.constant 0.000000e+00 : f32
    %6 = vector.broadcast %cst_5 : f32 to vector<64x128xf32>
    %7 = arith.maximumf %5, %6 : vector<64x128xf32>
    %c0_6 = arith.constant 0 : index
    %c0_7 = arith.constant 0 : index
    %8 = vector.load %arg4[%c0_6, %c0_7] : memref<32x64xbf16, #tpu.memory_space<vmem>>, vector<32x64xbf16>
    %9 = arith.truncf %7 : vector<64x128xf32> to vector<64x128xbf16>
    %cst_8 = arith.constant dense<0.000000e+00> : vector<32x128xf32>
    %10 = tpu.matmul %8, %9, %cst_8 {dimension_numbers = #tpu.dot_dimension_numbers<[1], [0], [0], [1], [0, 0, 1, 1], [], []>} : vector<32x64xbf16>, vector<64x128xbf16>, vector<32x128xf32> -> vector<32x128xf32>
    %c0_9 = arith.constant 0 : index
    %c0_10 = arith.constant 0 : index
    %11 = vector.load %arg5[%c0_9, %c0_10] : memref<32x1xf32, #tpu.memory_space<vmem>>, vector<32x1xf32>
    %12 = vector.broadcast %11 : vector<32x1xf32> to vector<32x128xf32>
    %13 = arith.addf %10, %12 : vector<32x128xf32>
    %cst_11 = arith.constant 0.000000e+00 : f32
    %14 = vector.broadcast %cst_11 : f32 to vector<32x128xf32>
    %15 = arith.maximumf %13, %14 : vector<32x128xf32>
    %c0_12 = arith.constant 0 : index
    %c0_13 = arith.constant 0 : index
    %16 = vector.load %arg6[%c0_12, %c0_13] : memref<8x32xbf16, #tpu.memory_space<vmem>>, vector<8x32xbf16>
    %17 = arith.truncf %15 : vector<32x128xf32> to vector<32x128xbf16>
    %cst_14 = arith.constant dense<0.000000e+00> : vector<8x128xf32>
    %18 = tpu.matmul %16, %17, %cst_14 {dimension_numbers = #tpu.dot_dimension_numbers<[1], [0], [0], [1], [0, 0, 1, 1], [], []>} : vector<8x32xbf16>, vector<32x128xbf16>, vector<8x128xf32> -> vector<8x128xf32>
    %c0_15 = arith.constant 0 : index
    %c0_16 = arith.constant 0 : index
    %19 = vector.load %arg7[%c0_15, %c0_16] : memref<8x1xf32, #tpu.memory_space<vmem>>, vector<8x1xf32>
    %20 = vector.broadcast %19 : vector<8x1xf32> to vector<8x128xf32>
    %21 = arith.addf %18, %20 : vector<8x128xf32>
    %c0_17 = arith.constant 0 : index
    %c0_18 = arith.constant 0 : index
    %22 = vector.load %arg8[%c0_17, %c0_18] : memref<8x128xf32, #tpu.memory_space<vmem>>, vector<8x128xf32>
    tpu.vector_store %arg8[%c0_17, %c0_18], %21 {strides = array<i32>} : memref<8x128xf32, #tpu.memory_space<vmem>>, vector<8x128xf32>,
    return
  }
  func.func @transform_0(%arg0: i32) -> (i32, i32) {
    %c0_i32 = arith.constant 0 : i32
    %c0_i32_0 = arith.constant 0 : i32
    return %c0_i32, %arg0 : i32, i32
  }
  func.func @transform_1(%arg0: i32) -> (i32, i32) {
    %c0_i32 = arith.constant 0 : i32
    %c0_i32_0 = arith.constant 0 : i32
    %c0_i32_1 = arith.constant 0 : i32
    return %c0_i32, %c0_i32_0 : i32, i32
  }
  func.func @transform_2(%arg0: i32) -> (i32, i32) {
    %c0_i32 = arith.constant 0 : i32
    %c0_i32_0 = arith.constant 0 : i32
    %c0_i32_1 = arith.constant 0 : i32
    return %c0_i32, %c0_i32_0 : i32, i32
  }
  func.func @transform_3(%arg0: i32) -> (i32, i32) {
    %c0_i32 = arith.constant 0 : i32
    %c0_i32_0 = arith.constant 0 : i32
    %c0_i32_1 = arith.constant 0 : i32
    return %c0_i32, %c0_i32_0 : i32, i32
  }
  func.func @transform_4(%arg0: i32) -> (i32, i32) {
    %c0_i32 = arith.constant 0 : i32
    %c0_i32_0 = arith.constant 0 : i32
    %c0_i32_1 = arith.constant 0 : i32
    return %c0_i32, %c0_i32_0 : i32, i32
  }
  func.func @transform_5(%arg0: i32) -> (i32, i32) {
    %c0_i32 = arith.constant 0 : i32
    %c0_i32_0 = arith.constant 0 : i32
    %c0_i32_1 = arith.constant 0 : i32
    return %c0_i32, %c0_i32_0 : i32, i32
  }
  func.func @transform_6(%arg0: i32) -> (i32, i32) {
    %c0_i32 = arith.constant 0 : i32
    %c0_i32_0 = arith.constant 0 : i32
    %c0_i32_1 = arith.constant 0 : i32
    return %c0_i32, %c0_i32_0 : i32, i32
  }
  func.func @transform_7(%arg0: i32) -> (i32, i32) {
    %c0_i32 = arith.constant 0 : i32
    %c0_i32_0 = arith.constant 0 : i32
    return %c0_i32, %arg0 : i32, i32
  }
}

</mosaic_0001>

<bundles_post_ra>
// kernel: tpu_custom_call.1
= control target key start
LH: loop header
LB: loop body
LE: loop exit
PB: predicated region body
PF: predicated region fallthrough
CT: control target
= control target key end

     0   :  { %vm112_vm0 = vcmask 130048   ;;  %v461_v3 = vmov 0   ;;  %s577_s0 = inlined_call_operand.vmem [shape: bf16[16,128], index: 0, kind: input, shape index: {}]   ;;  %s578_s1 = inlined_call_operand.vmem [shape: bf16[64,16], index: 1, kind: input, shape index: {}]   ;;  %s579_s2 = inlined_call_operand.vmem [shape: f32[64,1], index: 2, kind: input, shape index: {}]   ;;  %s580_s3 = inlined_call_operand.vmem [shape: bf16[32,64], index: 3, kind: input, shape index: {}]   ;;  %s581_s4 = inlined_call_operand.vmem [shape: f32[32,1], index: 4, kind: input, shape index: {}]   ;;  %s582_s5 = inlined_call_operand.vmem [shape: bf16[8,32], index: 5, kind: input, shape index: {}]   ;;  %s583_s6 = inlined_call_operand.vmem [shape: f32[8,1], index: 6, kind: input, shape index: {}]   ;;  %s584_s7 = inlined_call_operand.hbm [shape: f32[8,128], index: 7, kind: output, shape index: {}]  }
   0x1   :  { %v432_v0 = vld [vmem:[%s577_s0] sm:$0xff]   ;;  %v434_v2 = vld [vmem:[%s578_s1 + $0x8] sm:$0xff]   ;;  %430 = vset.pattern.permute.xlu0 %v461_v3  ;;  %v435_v4 = vld [vmem:[%s578_s1 + $0x10] sm:$0xff]   ;;  %431 = vset.pattern.permute.xlu1 %v461_v3 }
   0x2   :  { %v433_v1 = vld [vmem:[%s578_s1] sm:$0xff]   ;;  %396 = vmatprep.subr.bf16.mxu0 %v432_v0  ;;  %v44_v5 = vld [vmem:[%s579_s2 + $0x30] sm:$0xff]  ;;  %v45_v7 = vld [vmem:[%s579_s2 + $0x38] sm:$0xff] }
   0x3   :  { %397 = vmatpush3.bf16.msra.mxu0 %v432_v0  ;;  %398 = vmatprep.mubr.msk.bf16.mxu0 %vm112_vm0, %v433_v1  ;;  %v42_v6 = vld [vmem:[%s579_s2 + $0x20] sm:$0xff]  ;;  %v43_v8 = vld [vmem:[%s579_s2 + $0x28] sm:$0xff]  ;;  %v436_v9 = vld [vmem:[%s578_s1 + $0x18] sm:$0xff]  }
   0x4   :  { %78 = vperm.xlu0 %430, %v44_v5   ;;  %68 = vperm.xlu1 %431, %v42_v6  }
   0x6   :  { %399 = vmatmul.mubr.msk.bf16.vlgmr.msra.gmra.mxu0 %vm112_vm0, %v434_v2 }
   0x7   :  { %402 = vmatprep.mubr.msk.bf16.mxu0 %vm112_vm0, %v435_v4 }
   0x8   :  { %83 = vperm.xlu0 %430, %v45_v7  }
   0x9   :  { %12 = vsyncpa [#allocation3], 0  ;;  %v40_v10 = vld [vmem:[%s579_s2 + $0x10] sm:$0xff]  ;;  %73 = vperm.xlu1 %431, %v43_v8   ;;  %v41_v11 = vld [vmem:[%s579_s2 + $0x18] sm:$0xff]  ;;  %vm240_vm1 = vcmask 523264   ;;  %v462_v57 = vmov 0.0  }
   0xa   :  { %v38_v12 = vld [vmem:[%s579_s2] sm:$0xff]  ;;  %v39_v13 = vld [vmem:[%s579_s2 + $0x8] sm:$0xff]  ;;  %v208_v14 = vld [vmem:[%s581_s4 + $0x10] sm:$0xff]  ;;  %418 = vmatprep.subr.bf16.mxu0 %v462_v57  ;;  %vm463_vm2 = vmmov 0   ;;  %vm309_vm3 = vcmask 261120   ;;  %s464_s13 = smov [#allocation2]  }
   0xb   :  { %v209_v15 = vld [vmem:[%s581_s4 + $0x18] sm:$0xff]  ;;  %v206_v16 = vld [vmem:[%s581_s4] sm:$0xff]  ;;  %v207_v17 = vld [vmem:[%s581_s4 + $0x8] sm:$0xff]  ;;  %s360_s14 = sshll.u32 %s464_s13, 4  ;;  %s361_s14 = int_to_ptr.vmem [resolvable:$true] %s360_s14 }
   0xc   :  { %58 = vperm.xlu0 %430, %v40_v10   ;;  %v303_v18 = vld [vmem:[%s583_s6] sm:$0xff]  ;;  %v438_v56 = vld [vmem:[%s580_s3 + $0x8] sm:$0xff]   ;;  %s439_s15 = scalar_lea.vmem %s361_s14, 128  ;;  %p444_p1 = scmp.lt.s32.totalorder %s361_s14, %s361_s14 }
   0xd   :  { %63 = vperm.xlu1 %431, %v41_v11   ;;  %v437_v19 = vld [vmem:[%s580_s3] sm:$0xff]   ;;  %p440_p0 = scmp.ne.s32.totalorder %s361_s14, %s439_s15  ;;  %p445_p2 = scmp.lt.s32.totalorder %s439_s15, %s439_s15 }
   0xe   :  { %403 = vmatmul.mubr.msk.bf16.gmra.mxu0 %vm112_vm0, %v436_v9  ;;  %414 = vmatprep.mubr.msk.bf16.mxu1 %vm240_vm1, %v437_v19 }
   0xf   :  { %422 = vmatprep.mubr.msk.bf16.mxu0 %vm463_vm2, %v462_v57  ;;  %p446_p3 = por %p445_p2, %p444_p1 }
  0x10   :  { %48 = vperm.xlu0 %430, %v38_v12   ;;  %v300_v12 = vld [vmem:[%s582_s5] sm:$0xf] }
  0x11   :  { %53 = vperm.xlu1 %431, %v39_v13   ;;  %p447_p4 = pnand %p446_p3, %p440_p0 }
  0x14   :  { %222 = vperm.xlu0 %430, %v208_v14  }
  0x15   :  { %227 = vperm.xlu1 %431, %v209_v15  }
  0x18   :  { %212 = vperm.xlu0 %430, %v206_v16  }
  0x19   :  { %217 = vperm.xlu1 %431, %v207_v17  }
  0x1c   :  { %306 = vperm.xlu0 %430, %v303_v18  }
  0x7f   :  { %v69_v20 = vpop.permute.xlu1 %68  ;;  %v79_v22 = vpop.permute.xlu0 %78 }
  0x83   :  { %v84_v27 = vpop.permute.xlu0 %83 }
  0x84   :  { %v74_v25 = vpop.permute.xlu1 %73 }
  0x87   :  { %v59_v35 = vpop.permute.xlu0 %58 }
  0x88   :  { %v64_v31 = vpop.permute.xlu1 %63 }
  0x8b   :  { %v49_v49 = vpop.permute.xlu0 %48 }
  0x8c   :  { %v54_v45 = vpop.permute.xlu1 %53 }
  0x8f   :  { %v223_v58 = vpop.permute.xlu0 %222 }
  0x90   :  { %v228_v59 = vpop.permute.xlu1 %227 }
  0x93   :  { %v213_v0 = vpop.permute.xlu0 %212 }
  0x94   :  { %v218_v2 = vpop.permute.xlu1 %217 }
  0x97   :  { %v307_v13 = vpop.permute.xlu0 %306 }
  0xc6   :  { %v400_v21 = vpop.f32.mrf.mxu0 }
  0xc7   :  { %v168_v41 = vadd.f32 %v400_v21, %v59_v35 }
  0xc8   :  { %v159_v23 = vpop.f32.mrf.mxu0 }
  0xc9   :  { %v192_v50 = vmax.f32 %v168_v41, 0.0  ;;  %v160_v51 = vadd.f32 %v159_v23, %v49_v49 }
  0xca   :  { %v401_v24 = vpop.f32.mrf.mxu0 }
  0xcb   :  { %v171_v37 = vadd.f32 %v401_v24, %v64_v31  ;;  %v190_v54 = vmax.f32 %v160_v51, 0.0 }
  0xcc   :  { %v162_v26 = vpop.f32.mrf.mxu0 }
  0xcd   :  { %v193_v46 = vmax.f32 %v171_v37, 0.0  ;;  %v163_v47 = vadd.f32 %v162_v26, %v54_v45 }
  0xce   :  { %v404_v28 = vpop.f32.mrf.mxu0 }
  0xcf   :  { %v184_v30 = vadd.f32 %v404_v28, %v79_v22  ;;  %v203_v52 = vpack.c.bf16 %v193_v46, %v192_v50  ;;  %v191_v53 = vmax.f32 %v163_v47, 0.0 }
  0xd0   :  { %v175_v29 = vpop.f32.mrf.mxu0 }
  0xd1   :  { %v176_v33 = vadd.f32 %v175_v29, %v69_v20  ;;  %v196_v38 = vmax.f32 %v184_v30, 0.0  ;;  %v202_v55 = vpack.c.bf16 %v191_v53, %v190_v54 }
  0xd2   :  { %v405_v32 = vpop.f32.mrf.mxu0 }
  0xd3   :  { %v187_v34 = vadd.f32 %v405_v32, %v84_v27  ;;  %v194_v42 = vmax.f32 %v176_v33, 0.0 }
  0xd4   :  { %v178_v36 = vpop.f32.mrf.mxu0 }
  0xd5   :  { %v197_v39 = vmax.f32 %v187_v34, 0.0  ;;  %v179_v40 = vadd.f32 %v178_v36, %v74_v25 }
  0xd7   :  { %v195_v43 = vmax.f32 %v179_v40, 0.0  ;;  %v205_v44 = vpack.c.bf16 %v197_v39, %v196_v38 }
  0xd9   :  { %v204_v48 = vpack.c.bf16 %v195_v43, %v194_v42  ;;  %406 = vmatprep.subr.bf16.mxu1 %v205_v44 }
  0xda   :  { %407 = vmatpush3.bf16.msra.mxu1 %v205_v44 }
  0xdb   :  { %408 = vmatprep.subr.bf16.mxu1 %v204_v48 }
  0xde   :  { %409 = vmatpush3.bf16.msra.mxu1 %v204_v48 }
  0xdf   :  { %410 = vmatprep.subr.bf16.mxu1 %v203_v52 }
  0xe2   :  { %411 = vmatpush3.bf16.msra.mxu1 %v203_v52 }
  0xe3   :  { %412 = vmatprep.subr.bf16.mxu1 %v202_v55 }
  0xe6   :  { %413 = vmatpush3.bf16.msra.mxu1 %v202_v55 }
  0xe9   :  { %415 = vmatmul.mubr.msk.bf16.vlgmr.msra.gmra.mxu1 %vm240_vm1, %v438_v56 }
 0x1a9   :  { %v416_v60 = vpop.f32.mrf.mxu1 }
 0x1aa   :  { %v290_v62 = vadd.f32 %v416_v60, %v223_v58 }
 0x1ab   :  { %v281_v61 = vpop.f32.mrf.mxu1 }
 0x1ac   :  { %v298_v4 = vmax.f32 %v290_v62, 0.0  ;;  %v282_v5 = vadd.f32 %v281_v61, %v213_v0 }
 0x1ad   :  { %v417_v63 = vpop.f32.mrf.mxu1 }
 0x1ae   :  { %v293_v1 = vadd.f32 %v417_v63, %v228_v59  ;;  %v296_v10 = vmax.f32 %v282_v5, 0.0 }
 0x1af   :  { %v284_v3 = vpop.f32.mrf.mxu1 }
 0x1b0   :  { %v299_v6 = vmax.f32 %v293_v1, 0.0  ;;  %v285_v7 = vadd.f32 %v284_v3, %v218_v2 }
 0x1b2   :  { %v302_v8 = vpack.c.bf16 %v299_v6, %v298_v4  ;;  %v297_v9 = vmax.f32 %v285_v7, 0.0 }
 0x1b4   :  { %419 = vmatpush3.bf16.msra.mxu0 %v302_v8  ;;  %v301_v11 = vpack.c.bf16 %v297_v9, %v296_v10 }
 0x1b5   :  { %420 = vmatprep.subr.bf16.mxu0 %v462_v57 }
 0x1b8   :  { %421 = vmatpush3.bf16.msra.mxu0 %v301_v11 }
 0x1bb   :  { %423 = vmatmul.mubr.msk.bf16.vlgmr.msra.gmra.mxu0 %vm309_vm3, %v300_v12 }
 0x27b   :  { %v347_v14 = vpop.f32.mrf.mxu0 }
 0x27c   :  { %v348_v15 = vadd.f32 %v347_v14, %v307_v13 }
 0x27d   :  { %v424_v16 = vpop.f32.mrf.mxu0 }
 0x27e   :  { %353 = vst [vmem:[#allocation2] sm:$0xff] %v348_v15 }
 0x27f   :  { %v350_v17 = vpop.f32.mrf.mxu0 }
 0x280   :  { %450 = shalt.err (!%p447_p4)
}
 0x281   :  { %363 = dma.vmem_to_hbm [thread:$0]  %s361_s14, 128, %s584_s7, [#allocation3]   ;;  %v425_v18 = vpop.f32.mrf.mxu0 }
 0x282   :  { %459 = dma.done.wait [#allocation3], 128  }
 0x283   :  { %460 = vsyncadd [#allocation3], 4294967168 }
 0x284   :  { %367 = vsyncpa [#allocation3], 1 }

</bundles_post_ra>
